<compile_context>
chip_gen: v6e
topology: v6e:2x2x1
jax: 0.10.0
libtpu: 0.0.40
codegen_flags: <defaults>
</compile_context>

<pallas_src>
import functools

import jax
import jax.numpy as jnp
import numpy as np
from jax.experimental import pallas as pl
from jax.experimental.pallas import tpu as pltpu

NEG_SLOPE = 0.1
BN_EPS = 1e-5
LANE = 128
MAX_COL_TILE = 1024          # lane columns per grid step (review: 512 -> 1024)
VMEM_LIMIT = 32 * 1024 * 1024


def _leaky(x):
    return jnp.where(x > 0, x, NEG_SLOPE * x)


def _round_up(a, b):
    return -(-a // b) * b


# --------------------------------------------------------------------------- #
# Stage 1 (per (batch, Lout-tile)): both branches' convs.
#   outputs: h2 (branch-1 pre-BN2, bf16), z2 (branch-2 finished, bf16),
#            BN2 per-tile partial stats (f32).
# --------------------------------------------------------------------------- #
def _stage1_kernel(xm_ref, xe_ref, xo_ref, w1s_ref, c1_ref, w2t_ref, b2_ref,
                   w3t_ref, b3_ref, h2_ref, z2_ref, stats_ref,
                   *, lout, tile_l, odd_len, partial_tile):
    f32 = jnp.float32
    bf16 = jnp.bfloat16

    # Global output-position index of every lane column in this tile.
    col = (jax.lax.broadcasted_iota(jnp.int32, (1, tile_l), 1)
           + pl.program_id(1) * tile_l)

    xm = xm_ref[0]                  # (Cin, tile_l) bf16 : x[2t-1] (zero col at t==0)
    xe = xe_ref[0]                  #                      x[2t]
    xo = xo_ref[0]                  #                      x[2t+1] (zero col at t==Lout-1 if L odd)

    w1s = w1s_ref[...]              # (Cout, Cin) bf16, BN1 scale folded in
    c1 = c1_ref[...]                # (Cout, 1)   f32,  conv bias + BN1 shift folded

    def conv1x1_bn_act(cols):
        return _leaky(jnp.dot(w1s, cols, preferred_element_type=f32) + c1)

    # Branch-1 first conv + BN1 + LeakyReLU on the three stride-2 tap views.
    # The k=3/s=2/pad=1 conv pads the *activations* a1; LeakyReLU(c1) != 0, so
    # the taps that fall on that padding must be zeroed explicitly.
    a1m = conv1x1_bn_act(xm)
    a1m = jnp.where(col == 0, 0.0, a1m)                 # left activation pad (t == 0)
    a1e = conv1x1_bn_act(xe)
    a1p = conv1x1_bn_act(xo)
    if odd_len:                                         # compile-time specialization
        a1p = jnp.where(col == lout - 1, 0.0, a1p)      # right pad only if L was odd

    # Branch-1 second conv (k=3, s=2): three accumulated MXU dots (no concat).
    h2 = (jnp.dot(w2t_ref[0], a1m.astype(bf16), preferred_element_type=f32)
          + jnp.dot(w2t_ref[1], a1e.astype(bf16), preferred_element_type=f32)
          + jnp.dot(w2t_ref[2], a1p.astype(bf16), preferred_element_type=f32)
          + b2_ref[...])

    # Branch-2 conv (k=3, s=2) + LeakyReLU.  Its padding is of the *input* x,
    # which is genuinely zero in xm/xo, so no activation mask is needed.
    z2 = _leaky(jnp.dot(w3t_ref[0], xm, preferred_element_type=f32)
                + jnp.dot(w3t_ref[1], xe, preferred_element_type=f32)
                + jnp.dot(w3t_ref[2], xo, preferred_element_type=f32)
                + b3_ref[...])

    # BN2 partial statistics over this tile's valid columns (f32, taken before
    # the bf16 storage cast).  jnp.where (not multiply) so garbage columns of a
    # partial boundary tile can never poison the sums.
    if partial_tile:
        h2m = jnp.where(col < lout, h2, 0.0)
    else:
        h2m = h2
    stats_ref[0, 0, :, 0:1] = jnp.sum(h2m, axis=1, keepdims=True)
    stats_ref[0, 0, :, 1:2] = jnp.sum(h2m * h2m, axis=1, keepdims=True)

    h2_ref[0] = h2.astype(bf16)
    z2_ref[0] = z2.astype(bf16)


# --------------------------------------------------------------------------- #
# Stage 2 (per (batch, Lout-tile)): BN2 + LeakyReLU + residual add.
# Writes the final (B, Cout, Lout) layout directly.
# --------------------------------------------------------------------------- #
def _stage2_kernel(h2_ref, z2_ref, scale2_ref, shift2_ref, out_ref):
    h2 = h2_ref[0].astype(jnp.float32)
    z2 = z2_ref[0].astype(jnp.float32)
    out_ref[0] = _leaky(h2 * scale2_ref[...] + shift2_ref[...]) + z2


@jax.jit
def resnet_ibn_forward(x, params):
    """x: (B, Cin, L) float32, PyTorch NCL layout.  Returns (B, Cout, Lout) f32."""
    f32 = jnp.float32
    bf16 = jnp.bfloat16
    hi = jax.lax.Precision.HIGHEST
    B, Cin, L = x.shape
    Cout = params["w1"].shape[0]

    # ---- BN1 statistics: exact closed form from x (tiny Cin x Cin Gram) -------
    x = x.astype(f32)
    mx = jnp.mean(x, axis=(0, 2))                                    # (Cin,)
    xc = x - mx[None, :, None]
    cov = jnp.einsum("bil,bjl->ij", xc, xc, precision=hi) / (B * L)  # biased (train BN)

    w1, b1 = params["w1"], params["b1"]
    mean1 = jnp.dot(w1, mx, precision=hi) + b1
    var1 = jnp.maximum(jnp.einsum("oi,ij,oj->o", w1, cov, w1, precision=hi), 0.0)
    scale1 = params["g1"] * jax.lax.rsqrt(var1 + BN_EPS)
    w1s = (w1 * scale1[:, None]).astype(bf16)        # BN1 scale folded into conv
    c1 = scale1 * (b1 - mean1) + params["be1"]       # conv bias + BN1 shift folded

    # ---- stride-2 tap slabs, kept in (B, C, Lout) layout -----------------------
    odd_len = (L % 2) == 1
    xp = jnp.pad(x, ((0, 0), (0, 0), (0, 1))) if odd_len else x
    Lout = xp.shape[2] // 2
    xe = xp[:, :, 0::2]                                             # x[2t]
    xo = xp[:, :, 1::2]                                             # x[2t+1]
    xm = jnp.pad(xo[:, :, :Lout - 1], ((0, 0), (0, 0), (1, 0)))     # x[2t-1]
    # TODO(synk): verify with xprof that this de-interleave fuses into one
    # producer pass over x; if not, pre-pack the taps outside the jit boundary.
    xm = xm.astype(bf16)
    xe = xe.astype(bf16)
    xo = xo.astype(bf16)

    # ---- lane tiling over the output length -----------------------------------
    tile_l = min(MAX_COL_TILE, _round_up(Lout, LANE))
    n_l = pl.cdiv(Lout, tile_l)
    if B * n_l < 2 and Lout > LANE:          # v7x: keep >= 2 grid steps (2 cores)
        tile_l = _round_up(pl.cdiv(Lout, 2), LANE)
        n_l = pl.cdiv(Lout, tile_l)
    partial_tile = (Lout % tile_l) != 0

    # fused tap weights (tap k = 0,1,2 in the leading dim -> pairs xm/xe/xo)
    w2t = params["w2"].transpose(2, 0, 1).astype(bf16)   # (3, Cout, Cout)
    w3t = params["w3"].transpose(2, 0, 1).astype(bf16)   # (3, Cout, Cin)

    col = lambda v: v.reshape(-1, 1).astype(f32)
    tap_spec = pl.BlockSpec((1, Cin, tile_l), lambda b, l: (b, 0, l))
    act_spec = pl.BlockSpec((1, Cout, tile_l), lambda b, l: (b, 0, l))
    vec_spec = pl.BlockSpec((Cout, 1), lambda b, l: (0, 0))
    w1_spec = pl.BlockSpec((Cout, Cin), lambda b, l: (0, 0))
    w2_spec = pl.BlockSpec((3, Cout, Cout), lambda b, l: (0, 0, 0))
    w3_spec = pl.BlockSpec((3, Cout, Cin), lambda b, l: (0, 0, 0))
    stats_spec = pl.BlockSpec((1, 1, Cout, 2), lambda b, l: (b, l, 0, 0))
    cparams = pltpu.CompilerParams(
        dimension_semantics=("parallel", "parallel"),
        vmem_limit_bytes=VMEM_LIMIT)

    kernel1 = functools.partial(_stage1_kernel, lout=Lout, tile_l=tile_l,
                                odd_len=odd_len, partial_tile=partial_tile)

    h2, z2, stats = pl.pallas_call(
        kernel1,
        out_shape=(jax.ShapeDtypeStruct((B, Cout, Lout), bf16),
                   jax.ShapeDtypeStruct((B, Cout, Lout), bf16),
                   jax.ShapeDtypeStruct((B, n_l, Cout, 2), f32)),
        grid=(B, n_l),
        in_specs=[tap_spec, tap_spec, tap_spec,
                  w1_spec, vec_spec, w2_spec, vec_spec, w3_spec, vec_spec],
        out_specs=(act_spec, act_spec, stats_spec),
        compiler_params=cparams,
    )(xm, xe, xo, w1s, col(c1), w2t, col(params["b2"]), w3t, col(params["b3"]))

    # ---- BN2 from the per-tile partials (no re-read of the h2 slab) -----------
    cnt = float(B * Lout)
    ssum = jnp.sum(stats[..., 0], axis=(0, 1))
    ssq = jnp.sum(stats[..., 1], axis=(0, 1))
    m2 = ssum / cnt
    v2 = jnp.maximum(ssq / cnt - m2 * m2, 0.0)
    scale2 = params["g2"] * jax.lax.rsqrt(v2 + BN_EPS)
    shift2 = params["be2"] - m2 * scale2

    # ---- Stage 2: BN2 apply + LeakyReLU + residual add, final layout ----------
    out = pl.pallas_call(
        _stage2_kernel,
        out_shape=jax.ShapeDtypeStruct((B, Cout, Lout), f32),
        grid=(B, n_l),
        in_specs=[act_spec, act_spec, vec_spec, vec_spec],
        out_specs=act_spec,
        compiler_params=cparams,
    )(h2, z2, col(scale2), col(shift2))
    return out


# --------------------------------------------------------------------------- #
# Pure-JAX reference matching PyTorch semantics (training-mode BatchNorm).
# --------------------------------------------------------------------------- #
def reference_forward(x, params):
    hi = jax.lax.Precision.HIGHEST

    def conv1d(h, w, b, stride, pad):
        y = jax.lax.conv_general_dilated(
            h, w, window_strides=(stride,), padding=[(pad, pad)],
            dimension_numbers=("NCH", "OIH", "NCH"), precision=hi)
        return y + b[None, :, None]

    def bn(h, g, be):
        m = h.mean(axis=(0, 2), keepdims=True)
        v = ((h - m) ** 2).mean(axis=(0, 2), keepdims=True)
        return (h - m) / jnp.sqrt(v + BN_EPS) * g[None, :, None] + be[None, :, None]

    lrelu = lambda h: jnp.where(h > 0, h, NEG_SLOPE * h)

    h = conv1d(x, params["w1"][:, :, None], params["b1"], 1, 0)
    h = lrelu(bn(h, params["g1"], params["be1"]))
    h = conv1d(h, params["w2"], params["b2"], 2, 1)
    h = lrelu(bn(h, params["g2"], params["be2"]))
    g = lrelu(conv1d(x, params["w3"], params["b3"], 2, 1))
    return h + g


def init_params(key, in_channel, out_channel):
    ks = jax.random.split(key, 6)
    f32 = jnp.float32
    return {
        # conv1[0]: Conv1d(Cin, Cout, k=1)
        "w1": jax.random.normal(ks[0], (out_channel, in_channel), f32) / np.sqrt(in_channel),
        "b1": 0.01 * jax.random.normal(ks[1], (out_channel,), f32),
        # BN1 (PyTorch default init)
        "g1": jnp.ones((out_channel,), f32),
        "be1": jnp.zeros((out_channel,), f32),
        # conv1[3]: Conv1d(Cout, Cout, k=3, s=2, pad=1)
        "w2": jax.random.normal(ks[2], (out_channel, out_channel, 3), f32) / np.sqrt(3 * out_channel),
        "b2": 0.01 * jax.random.normal(ks[3], (out_channel,), f32),
        # BN2
        "g2": jnp.ones((out_channel,), f32),
        "be2": jnp.zeros((out_channel,), f32),
        # conv2[0]: Conv1d(Cin, Cout, k=3, s=2, pad=1)
        "w3": jax.random.normal(ks[4], (out_channel, in_channel, 3), f32) / np.sqrt(3 * in_channel),
        "b3": 0.01 * jax.random.normal(ks[5], (out_channel,), f32),
    }


if __name__ == "__main__":
    B, Cin, Cout, L = 2, 4, 8, 16

    key = jax.random.PRNGKey(0)
    kx, kp = jax.random.split(key)
    x = jax.random.normal(kx, (B, Cin, L), jnp.float32)
    params = init_params(kp, Cin, Cout)

    out = jax.block_until_ready(resnet_ibn_forward(x, params))
    ref = jax.block_until_ready(reference_forward(x, params))

    assert out.shape == (B, Cout, (L + 2 * 1 - 3) // 2 + 1)
    # bf16 MXU operands + bf16 h2/z2 storage => allow small absolute error vs the
    # f32 reference; structural bugs would show up as O(0.1..1) differences.
    np.testing.assert_allclose(np.asarray(out), np.asarray(ref), rtol=5e-2, atol=1e-1)
    print("KERNEL_OK")
</pallas_src>

<mosaic_0001>
module attributes {stable_mosaic.version = 11 : i64} {
  func.func @_stage2_kernel(%arg0: i32, %arg1: i32, %arg2: memref<1x8x128xbf16, #tpu.memory_space<vmem>>, %arg3: memref<1x8x128xbf16, #tpu.memory_space<vmem>>, %arg4: memref<8x1xf32, #tpu.memory_space<vmem>>, %arg5: memref<8x1xf32, #tpu.memory_space<vmem>>, %arg6: memref<1x8x128xf32, #tpu.memory_space<vmem>>) attributes {dimension_semantics = [#tpu.dimension_semantics<parallel>, #tpu.dimension_semantics<parallel>], iteration_bounds = array<i64: 2, 1>, scalar_prefetch = 0 : i64, scratch_operands = 0 : i64, tpu.core_type = #tpu.core_type<tc>, window_params = [{transform_indices = @transform_0, window_bounds = array<i64: 1, 8, 128>}, {transform_indices = @transform_1, window_bounds = array<i64: 1, 8, 128>}, {pipeline_mode = #tpu.pipeline_mode<synchronous>, transform_indices = @transform_2, window_bounds = array<i64: 8, 1>}, {pipeline_mode = #tpu.pipeline_mode<synchronous>, transform_indices = @transform_3, window_bounds = array<i64: 8, 1>}, {transform_indices = @transform_4, window_bounds = array<i64: 1, 8, 128>}]} {
    %c0 = arith.constant 0 : index
    %c0_0 = arith.constant 0 : index
    %c0_1 = arith.constant 0 : index
    %0 = vector.load %arg2[%c0, %c0_0, %c0_1] : memref<1x8x128xbf16, #tpu.memory_space<vmem>>, vector<1x8x128xbf16>
    %1 = vector.shape_cast %0 : vector<1x8x128xbf16> to vector<8x128xbf16>
    %2 = arith.extf %1 : vector<8x128xbf16> to vector<8x128xf32>
    %c0_2 = arith.constant 0 : index
    %c0_3 = arith.constant 0 : index
    %c0_4 = arith.constant 0 : index
    %3 = vector.load %arg3[%c0_2, %c0_3, %c0_4] : memref<1x8x128xbf16, #tpu.memory_space<vmem>>, vector<1x8x128xbf16>
    %4 = vector.shape_cast %3 : vector<1x8x128xbf16> to vector<8x128xbf16>
    %5 = arith.extf %4 : vector<8x128xbf16> to vector<8x128xf32>
    %c0_5 = arith.constant 0 : index
    %c0_6 = arith.constant 0 : index
    %6 = vector.load %arg4[%c0_5, %c0_6] : memref<8x1xf32, #tpu.memory_space<vmem>>, vector<8x1xf32>
    %7 = vector.broadcast %6 : vector<8x1xf32> to vector<8x128xf32>
    %8 = arith.mulf %2, %7 : vector<8x128xf32>
    %c0_7 = arith.constant 0 : index
    %c0_8 = arith.constant 0 : index
    %9 = vector.load %arg5[%c0_7, %c0_8] : memref<8x1xf32, #tpu.memory_space<vmem>>, vector<8x1xf32>
    %10 = vector.broadcast %9 : vector<8x1xf32> to vector<8x128xf32>
    %11 = arith.addf %8, %10 : vector<8x128xf32>
    %cst = arith.constant 0.000000e+00 : f32
    %12 = vector.broadcast %cst : f32 to vector<8x128xf32>
    %13 = arith.cmpf ogt, %11, %12 : vector<8x128xf32>
    %cst_9 = arith.constant 1.000000e-01 : f32
    %14 = vector.broadcast %cst_9 : f32 to vector<8x128xf32>
    %15 = arith.mulf %14, %11 : vector<8x128xf32>
    %16 = arith.select %13, %11, %15 : vector<8x128xi1>, vector<8x128xf32>
    %17 = arith.addf %16, %5 : vector<8x128xf32>
    %c0_10 = arith.constant 0 : index
    %c0_11 = arith.constant 0 : index
    %c0_12 = arith.constant 0 : index
    %18 = vector.load %arg6[%c0_10, %c0_11, %c0_12] : memref<1x8x128xf32, #tpu.memory_space<vmem>>, vector<1x8x128xf32>
    %19 = vector.shape_cast %18 : vector<1x8x128xf32> to vector<8x128xf32>
    %20 = vector.shape_cast %17 : vector<8x128xf32> to vector<1x8x128xf32>
    tpu.vector_store %arg6[%c0_10, %c0_11, %c0_12], %20 {strides = array<i32>} : memref<1x8x128xf32, #tpu.memory_space<vmem>>, vector<1x8x128xf32>,
    return
  }
  func.func @transform_0(%arg0: i32, %arg1: i32) -> (i32, i32, i32) {
    %c0_i32 = arith.constant 0 : i32
    %c0_i32_0 = arith.constant 0 : i32
    return %arg0, %c0_i32, %arg1 : i32, i32, i32
  }
  func.func @transform_1(%arg0: i32, %arg1: i32) -> (i32, i32, i32) {
    %c0_i32 = arith.constant 0 : i32
    %c0_i32_0 = arith.constant 0 : i32
    return %arg0, %c0_i32, %arg1 : i32, i32, i32
  }
  func.func @transform_2(%arg0: i32, %arg1: i32) -> (i32, i32) {
    %c0_i32 = arith.constant 0 : i32
    %c0_i32_0 = arith.constant 0 : i32
    %c0_i32_1 = arith.constant 0 : i32
    return %c0_i32, %c0_i32_0 : i32, i32
  }
  func.func @transform_3(%arg0: i32, %arg1: i32) -> (i32, i32) {
    %c0_i32 = arith.constant 0 : i32
    %c0_i32_0 = arith.constant 0 : i32
    %c0_i32_1 = arith.constant 0 : i32
    return %c0_i32, %c0_i32_0 : i32, i32
  }
  func.func @transform_4(%arg0: i32, %arg1: i32) -> (i32, i32, i32) {
    %c0_i32 = arith.constant 0 : i32
    %c0_i32_0 = arith.constant 0 : i32
    return %arg0, %c0_i32, %arg1 : i32, i32, i32
  }
}

module attributes {stable_mosaic.version = 11 : i64} {
  func.func @_stage1_kernel(%arg0: i32, %arg1: i32, %arg2: memref<1x4x128xbf16, #tpu.memory_space<vmem>>, %arg3: memref<1x4x128xbf16, #tpu.memory_space<vmem>>, %arg4: memref<1x4x128xbf16, #tpu.memory_space<vmem>>, %arg5: memref<8x4xbf16, #tpu.memory_space<vmem>>, %arg6: memref<8x1xf32, #tpu.memory_space<vmem>>, %arg7: memref<3x8x8xbf16, #tpu.memory_space<vmem>>, %arg8: memref<8x1xf32, #tpu.memory_space<vmem>>, %arg9: memref<3x8x4xbf16, #tpu.memory_space<vmem>>, %arg10: memref<8x1xf32, #tpu.memory_space<vmem>>, %arg11: memref<1x8x128xbf16, #tpu.memory_space<vmem>>, %arg12: memref<1x8x128xbf16, #tpu.memory_space<vmem>>, %arg13: memref<1x1x8x2xf32, #tpu.memory_space<vmem>>) attributes {dimension_semantics = [#tpu.dimension_semantics<parallel>, #tpu.dimension_semantics<parallel>], iteration_bounds = array<i64: 2, 1>, scalar_prefetch = 0 : i64, scratch_operands = 0 : i64, tpu.core_type = #tpu.core_type<tc>, window_params = [{transform_indices = @transform_0, window_bounds = array<i64: 1, 4, 128>}, {transform_indices = @transform_1, window_bounds = array<i64: 1, 4, 128>}, {transform_indices = @transform_2, window_bounds = array<i64: 1, 4, 128>}, {pipeline_mode = #tpu.pipeline_mode<synchronous>, transform_indices = @transform_3, window_bounds = array<i64: 8, 4>}, {pipeline_mode = #tpu.pipeline_mode<synchronous>, transform_indices = @transform_4, window_bounds = array<i64: 8, 1>}, {pipeline_mode = #tpu.pipeline_mode<synchronous>, transform_indices = @transform_5, window_bounds = array<i64: 3, 8, 8>}, {pipeline_mode = #tpu.pipeline_mode<synchronous>, transform_indices = @transform_6, window_bounds = array<i64: 8, 1>}, {pipeline_mode = #tpu.pipeline_mode<synchronous>, transform_indices = @transform_7, window_bounds = array<i64: 3, 8, 4>}, {pipeline_mode = #tpu.pipeline_mode<synchronous>, transform_indices = @transform_8, window_bounds = array<i64: 8, 1>}, {transform_indices = @transform_9, window_bounds = array<i64: 1, 8, 128>}, {transform_indices = @transform_10, window_bounds = array<i64: 1, 8, 128>}, {transform_indices = @transform_11, window_bounds = array<i64: 1, 1, 8, 2>}]} {
    %0 = tpu.iota {dimensions = array<i32: 1>} : vector<1x128xi32>
    %c128_i32 = arith.constant 128 : i32
    %1 = arith.muli %arg1, %c128_i32 : i32
    %2 = vector.broadcast %1 : i32 to vector<1x128xi32>
    %3 = arith.addi %0, %2 : vector<1x128xi32>
    %c0 = arith.constant 0 : index
    %c0_0 = arith.constant 0 : index
    %c0_1 = arith.constant 0 : index
    %4 = vector.load %arg2[%c0, %c0_0, %c0_1] : memref<1x4x128xbf16, #tpu.memory_space<vmem>>, vector<1x4x128xbf16>
    %5 = vector.shape_cast %4 : vector<1x4x128xbf16> to vector<4x128xbf16>
    %c0_2 = arith.constant 0 : index
    %c0_3 = arith.constant 0 : index
    %c0_4 = arith.constant 0 : index
    %6 = vector.load %arg3[%c0_2, %c0_3, %c0_4] : memref<1x4x128xbf16, #tpu.memory_space<vmem>>, vector<1x4x128xbf16>
    %7 = vector.shape_cast %6 : vector<1x4x128xbf16> to vector<4x128xbf16>
    %c0_5 = arith.constant 0 : index
    %c0_6 = arith.constant 0 : index
    %c0_7 = arith.constant 0 : index
    %8 = vector.load %arg4[%c0_5, %c0_6, %c0_7] : memref<1x4x128xbf16, #tpu.memory_space<vmem>>, vector<1x4x128xbf16>
    %9 = vector.shape_cast %8 : vector<1x4x128xbf16> to vector<4x128xbf16>
    %c0_8 = arith.constant 0 : index
    %c0_9 = arith.constant 0 : index
    %10 = vector.load %arg5[%c0_8, %c0_9] : memref<8x4xbf16, #tpu.memory_space<vmem>>, vector<8x4xbf16>
    %c0_10 = arith.constant 0 : index
    %c0_11 = arith.constant 0 : index
    %11 = vector.load %arg6[%c0_10, %c0_11] : memref<8x1xf32, #tpu.memory_space<vmem>>, vector<8x1xf32>
    %cst = arith.constant dense<0.000000e+00> : vector<8x128xf32>
    %12 = tpu.matmul %10, %5, %cst {dimension_numbers = #tpu.dot_dimension_numbers<[1], [0], [0], [1], [0, 0, 1, 1], [], []>} : vector<8x4xbf16>, vector<4x128xbf16>, vector<8x128xf32> -> vector<8x128xf32>
    %13 = vector.broadcast %11 : vector<8x1xf32> to vector<8x128xf32>
    %14 = arith.addf %12, %13 : vector<8x128xf32>
    %cst_12 = arith.constant 0.000000e+00 : f32
    %15 = vector.broadcast %cst_12 : f32 to vector<8x128xf32>
    %16 = arith.cmpf ogt, %14, %15 : vector<8x128xf32>
    %cst_13 = arith.constant 1.000000e-01 : f32
    %17 = vector.broadcast %cst_13 : f32 to vector<8x128xf32>
    %18 = arith.mulf %17, %14 : vector<8x128xf32>
    %19 = arith.select %16, %14, %18 : vector<8x128xi1>, vector<8x128xf32>
    %c0_i32 = arith.constant 0 : i32
    %20 = vector.broadcast %c0_i32 : i32 to vector<1x128xi32>
    %21 = arith.cmpi eq, %3, %20 : vector<1x128xi32>
    %cst_14 = arith.constant 0.000000e+00 : f32
    %22 = vector.shape_cast %21 : vector<1x128xi1> to vector<1x128xi1>
    %23 = vector.broadcast %22 : vector<1x128xi1> to vector<8x128xi1>
    %24 = vector.broadcast %cst_14 : f32 to vector<8x128xf32>
    %25 = arith.select %23, %24, %19 : vector<8x128xi1>, vector<8x128xf32>
    %cst_15 = arith.constant dense<0.000000e+00> : vector<8x128xf32>
    %26 = tpu.matmul %10, %7, %cst_15 {dimension_numbers = #tpu.dot_dimension_numbers<[1], [0], [0], [1], [0, 0, 1, 1], [], []>} : vector<8x4xbf16>, vector<4x128xbf16>, vector<8x128xf32> -> vector<8x128xf32>
    %27 = vector.broadcast %11 : vector<8x1xf32> to vector<8x128xf32>
    %28 = arith.addf %26, %27 : vector<8x128xf32>
    %cst_16 = arith.constant 0.000000e+00 : f32
    %29 = vector.broadcast %cst_16 : f32 to vector<8x128xf32>
    %30 = arith.cmpf ogt, %28, %29 : vector<8x128xf32>
    %cst_17 = arith.constant 1.000000e-01 : f32
    %31 = vector.broadcast %cst_17 : f32 to vector<8x128xf32>
    %32 = arith.mulf %31, %28 : vector<8x128xf32>
    %33 = arith.select %30, %28, %32 : vector<8x128xi1>, vector<8x128xf32>
    %cst_18 = arith.constant dense<0.000000e+00> : vector<8x128xf32>
    %34 = tpu.matmul %10, %9, %cst_18 {dimension_numbers = #tpu.dot_dimension_numbers<[1], [0], [0], [1], [0, 0, 1, 1], [], []>} : vector<8x4xbf16>, vector<4x128xbf16>, vector<8x128xf32> -> vector<8x128xf32>
    %35 = vector.broadcast %11 : vector<8x1xf32> to vector<8x128xf32>
    %36 = arith.addf %34, %35 : vector<8x128xf32>
    %cst_19 = arith.constant 0.000000e+00 : f32
    %37 = vector.broadcast %cst_19 : f32 to vector<8x128xf32>
    %38 = arith.cmpf ogt, %36, %37 : vector<8x128xf32>
    %cst_20 = arith.constant 1.000000e-01 : f32
    %39 = vector.broadcast %cst_20 : f32 to vector<8x128xf32>
    %40 = arith.mulf %39, %36 : vector<8x128xf32>
    %41 = arith.select %38, %36, %40 : vector<8x128xi1>, vector<8x128xf32>
    %c0_21 = arith.constant 0 : index
    %c0_22 = arith.constant 0 : index
    %c0_23 = arith.constant 0 : index
    %42 = vector.load %arg7[%c0_21, %c0_22, %c0_23] : memref<3x8x8xbf16, #tpu.memory_space<vmem>>, vector<1x8x8xbf16>
    %43 = vector.shape_cast %42 : vector<1x8x8xbf16> to vector<8x8xbf16>
    %44 = arith.truncf %25 : vector<8x128xf32> to vector<8x128xbf16>
    %cst_24 = arith.constant dense<0.000000e+00> : vector<8x128xf32>
    %45 = tpu.matmul %43, %44, %cst_24 {dimension_numbers = #tpu.dot_dimension_numbers<[1], [0], [0], [1], [0, 0, 1, 1], [], []>} : vector<8x8xbf16>, vector<8x128xbf16>, vector<8x128xf32> -> vector<8x128xf32>
    %c1 = arith.constant 1 : index
    %c0_25 = arith.constant 0 : index
    %c0_26 = arith.constant 0 : index
    %46 = vector.load %arg7[%c1, %c0_25, %c0_26] : memref<3x8x8xbf16, #tpu.memory_space<vmem>>, vector<1x8x8xbf16>
    %47 = vector.shape_cast %46 : vector<1x8x8xbf16> to vector<8x8xbf16>
    %48 = arith.truncf %33 : vector<8x128xf32> to vector<8x128xbf16>
    %cst_27 = arith.constant dense<0.000000e+00> : vector<8x128xf32>
    %49 = tpu.matmul %47, %48, %cst_27 {dimension_numbers = #tpu.dot_dimension_numbers<[1], [0], [0], [1], [0, 0, 1, 1], [], []>} : vector<8x8xbf16>, vector<8x128xbf16>, vector<8x128xf32> -> vector<8x128xf32>
    %50 = arith.addf %45, %49 : vector<8x128xf32>
    %c2 = arith.constant 2 : index
    %c0_28 = arith.constant 0 : index
    %c0_29 = arith.constant 0 : index
    %51 = vector.load %arg7[%c2, %c0_28, %c0_29] : memref<3x8x8xbf16, #tpu.memory_space<vmem>>, vector<1x8x8xbf16>
    %52 = vector.shape_cast %51 : vector<1x8x8xbf16> to vector<8x8xbf16>
    %53 = arith.truncf %41 : vector<8x128xf32> to vector<8x128xbf16>
    %cst_30 = arith.constant dense<0.000000e+00> : vector<8x128xf32>
    %54 = tpu.matmul %52, %53, %cst_30 {dimension_numbers = #tpu.dot_dimension_numbers<[1], [0], [0], [1], [0, 0, 1, 1], [], []>} : vector<8x8xbf16>, vector<8x128xbf16>, vector<8x128xf32> -> vector<8x128xf32>
    %55 = arith.addf %50, %54 : vector<8x128xf32>
    %c0_31 = arith.constant 0 : index
    %c0_32 = arith.constant 0 : index
    %56 = vector.load %arg8[%c0_31, %c0_32] : memref<8x1xf32, #tpu.memory_space<vmem>>, vector<8x1xf32>
    %57 = vector.broadcast %56 : vector<8x1xf32> to vector<8x128xf32>
    %58 = arith.addf %55, %57 : vector<8x128xf32>
    %c0_33 = arith.constant 0 : index
    %c0_34 = arith.constant 0 : index
    %c0_35 = arith.constant 0 : index
    %59 = vector.load %arg9[%c0_33, %c0_34, %c0_35] : memref<3x8x4xbf16, #tpu.memory_space<vmem>>, vector<1x8x4xbf16>
    %60 = vector.shape_cast %59 : vector<1x8x4xbf16> to vector<8x4xbf16>
    %cst_36 = arith.constant dense<0.000000e+00> : vector<8x128xf32>
    %61 = tpu.matmul %60, %5, %cst_36 {dimension_numbers = #tpu.dot_dimension_numbers<[1], [0], [0], [1], [0, 0, 1, 1], [], []>} : vector<8x4xbf16>, vector<4x128xbf16>, vector<8x128xf32> -> vector<8x128xf32>
    %c1_37 = arith.constant 1 : index
    %c0_38 = arith.constant 0 : index
    %c0_39 = arith.constant 0 : index
    %62 = vector.load %arg9[%c1_37, %c0_38, %c0_39] : memref<3x8x4xbf16, #tpu.memory_space<vmem>>, vector<1x8x4xbf16>
    %63 = vector.shape_cast %62 : vector<1x8x4xbf16> to vector<8x4xbf16>
    %cst_40 = arith.constant dense<0.000000e+00> : vector<8x128xf32>
    %64 = tpu.matmul %63, %7, %cst_40 {dimension_numbers = #tpu.dot_dimension_numbers<[1], [0], [0], [1], [0, 0, 1, 1], [], []>} : vector<8x4xbf16>, vector<4x128xbf16>, vector<8x128xf32> -> vector<8x128xf32>
    %65 = arith.addf %61, %64 : vector<8x128xf32>
    %c2_41 = arith.constant 2 : index
    %c0_42 = arith.constant 0 : index
    %c0_43 = arith.constant 0 : index
    %66 = vector.load %arg9[%c2_41, %c0_42, %c0_43] : memref<3x8x4xbf16, #tpu.memory_space<vmem>>, vector<1x8x4xbf16>
    %67 = vector.shape_cast %66 : vector<1x8x4xbf16> to vector<8x4xbf16>
    %cst_44 = arith.constant dense<0.000000e+00> : vector<8x128xf32>
    %68 = tpu.matmul %67, %9, %cst_44 {dimension_numbers = #tpu.dot_dimension_numbers<[1], [0], [0], [1], [0, 0, 1, 1], [], []>} : vector<8x4xbf16>, vector<4x128xbf16>, vector<8x128xf32> -> vector<8x128xf32>
    %69 = arith.addf %65, %68 : vector<8x128xf32>
    %c0_45 = arith.constant 0 : index
    %c0_46 = arith.constant 0 : index
    %70 = vector.load %arg10[%c0_45, %c0_46] : memref<8x1xf32, #tpu.memory_space<vmem>>, vector<8x1xf32>
    %71 = vector.broadcast %70 : vector<8x1xf32> to vector<8x128xf32>
    %72 = arith.addf %69, %71 : vector<8x128xf32>
    %cst_47 = arith.constant 0.000000e+00 : f32
    %73 = vector.broadcast %cst_47 : f32 to vector<8x128xf32>
    %74 = arith.cmpf ogt, %72, %73 : vector<8x128xf32>
    %cst_48 = arith.constant 1.000000e-01 : f32
    %75 = vector.broadcast %cst_48 : f32 to vector<8x128xf32>
    %76 = arith.mulf %75, %72 : vector<8x128xf32>
    %77 = arith.select %74, %72, %76 : vector<8x128xi1>, vector<8x128xf32>
    %c8_i32 = arith.constant 8 : i32
    %78 = vector.broadcast %c8_i32 : i32 to vector<1x128xi32>
    %79 = arith.cmpi slt, %3, %78 : vector<1x128xi32>
    %cst_49 = arith.constant 0.000000e+00 : f32
    %80 = vector.shape_cast %79 : vector<1x128xi1> to vector<1x128xi1>
    %81 = vector.broadcast %80 : vector<1x128xi1> to vector<8x128xi1>
    %82 = vector.broadcast %cst_49 : f32 to vector<8x128xf32>
    %83 = arith.select %81, %58, %82 : vector<8x128xi1>, vector<8x128xf32>
    %cst_50 = arith.constant dense<0.000000e+00> : vector<8xf32>
    %84 = vector.multi_reduction <add>, %83, %cst_50 [1] : vector<8x128xf32> to vector<8xf32>
    %85 = vector.shape_cast %84 : vector<8xf32> to vector<8x1xf32>
    %c0_51 = arith.constant 0 : index
    %c0_52 = arith.constant 0 : index
    %c0_53 = arith.constant 0 : index
    %c0_54 = arith.constant 0 : index
    %86 = vector.load %arg13[%c0_51, %c0_52, %c0_53, %c0_54] : memref<1x1x8x2xf32, #tpu.memory_space<vmem>>, vector<1x1x8x1xf32>
    %87 = vector.shape_cast %86 : vector<1x1x8x1xf32> to vector<8x1xf32>
    %88 = vector.shape_cast %85 : vector<8x1xf32> to vector<1x1x8x1xf32>
    tpu.vector_store %arg13[%c0_51, %c0_52, %c0_53, %c0_54], %88 {strides = array<i32>} : memref<1x1x8x2xf32, #tpu.memory_space<vmem>>, vector<1x1x8x1xf32>,
    %89 = arith.mulf %83, %83 : vector<8x128xf32>
    %cst_55 = arith.constant dense<0.000000e+00> : vector<8xf32>
    %90 = vector.multi_reduction <add>, %89, %cst_55 [1] : vector<8x128xf32> to vector<8xf32>
    %91 = vector.shape_cast %90 : vector<8xf32> to vector<8x1xf32>
    %c0_56 = arith.constant 0 : index
    %c0_57 = arith.constant 0 : index
    %c0_58 = arith.constant 0 : index
    %c1_59 = arith.constant 1 : index
    %92 = vector.load %arg13[%c0_56, %c0_57, %c0_58, %c1_59] : memref<1x1x8x2xf32, #tpu.memory_space<vmem>>, vector<1x1x8x1xf32>
    %93 = vector.shape_cast %92 : vector<1x1x8x1xf32> to vector<8x1xf32>
    %94 = vector.shape_cast %91 : vector<8x1xf32> to vector<1x1x8x1xf32>
    tpu.vector_store %arg13[%c0_56, %c0_57, %c0_58, %c1_59], %94 {strides = array<i32>} : memref<1x1x8x2xf32, #tpu.memory_space<vmem>>, vector<1x1x8x1xf32>,
    %95 = arith.truncf %58 : vector<8x128xf32> to vector<8x128xbf16>
    %c0_60 = arith.constant 0 : index
    %c0_61 = arith.constant 0 : index
    %c0_62 = arith.constant 0 : index
    %96 = vector.load %arg11[%c0_60, %c0_61, %c0_62] : memref<1x8x128xbf16, #tpu.memory_space<vmem>>, vector<1x8x128xbf16>
    %97 = vector.shape_cast %96 : vector<1x8x128xbf16> to vector<8x128xbf16>
    %98 = vector.shape_cast %95 : vector<8x128xbf16> to vector<1x8x128xbf16>
    tpu.vector_store %arg11[%c0_60, %c0_61, %c0_62], %98 {strides = array<i32>} : memref<1x8x128xbf16, #tpu.memory_space<vmem>>, vector<1x8x128xbf16>,
    %99 = arith.truncf %77 : vector<8x128xf32> to vector<8x128xbf16>
    %c0_63 = arith.constant 0 : index
    %c0_64 = arith.constant 0 : index
    %c0_65 = arith.constant 0 : index
    %100 = vector.load %arg12[%c0_63, %c0_64, %c0_65] : memref<1x8x128xbf16, #tpu.memory_space<vmem>>, vector<1x8x128xbf16>
    %101 = vector.shape_cast %100 : vector<1x8x128xbf16> to vector<8x128xbf16>
    %102 = vector.shape_cast %99 : vector<8x128xbf16> to vector<1x8x128xbf16>
    tpu.vector_store %arg12[%c0_63, %c0_64, %c0_65], %102 {strides = array<i32>} : memref<1x8x128xbf16, #tpu.memory_space<vmem>>, vector<1x8x128xbf16>,
    return
  }
  func.func @transform_0(%arg0: i32, %arg1: i32) -> (i32, i32, i32) {
    %c0_i32 = arith.constant 0 : i32
    %c0_i32_0 = arith.constant 0 : i32
    return %arg0, %c0_i32, %arg1 : i32, i32, i32
  }
  func.func @transform_1(%arg0: i32, %arg1: i32) -> (i32, i32, i32) {
    %c0_i32 = arith.constant 0 : i32
    %c0_i32_0 = arith.constant 0 : i32
    return %arg0, %c0_i32, %arg1 : i32, i32, i32
  }
  func.func @transform_2(%arg0: i32, %arg1: i32) -> (i32, i32, i32) {
    %c0_i32 = arith.constant 0 : i32
    %c0_i32_0 = arith.constant 0 : i32
    return %arg0, %c0_i32, %arg1 : i32, i32, i32
  }
  func.func @transform_3(%arg0: i32, %arg1: i32) -> (i32, i32) {
    %c0_i32 = arith.constant 0 : i32
    %c0_i32_0 = arith.constant 0 : i32
    %c0_i32_1 = arith.constant 0 : i32
    return %c0_i32, %c0_i32_0 : i32, i32
  }
  func.func @transform_4(%arg0: i32, %arg1: i32) -> (i32, i32) {
    %c0_i32 = arith.constant 0 : i32
    %c0_i32_0 = arith.constant 0 : i32
    %c0_i32_1 = arith.constant 0 : i32
    return %c0_i32, %c0_i32_0 : i32, i32
  }
  func.func @transform_5(%arg0: i32, %arg1: i32) -> (i32, i32, i32) {
    %c0_i32 = arith.constant 0 : i32
    %c0_i32_0 = arith.constant 0 : i32
    %c0_i32_1 = arith.constant 0 : i32
    %c0_i32_2 = arith.constant 0 : i32
    return %c0_i32, %c0_i32_0, %c0_i32_1 : i32, i32, i32
  }
  func.func @transform_6(%arg0: i32, %arg1: i32) -> (i32, i32) {
    %c0_i32 = arith.constant 0 : i32
    %c0_i32_0 = arith.constant 0 : i32
    %c0_i32_1 = arith.constant 0 : i32
    return %c0_i32, %c0_i32_0 : i32, i32
  }
  func.func @transform_7(%arg0: i32, %arg1: i32) -> (i32, i32, i32) {
    %c0_i32 = arith.constant 0 : i32
    %c0_i32_0 = arith.constant 0 : i32
    %c0_i32_1 = arith.constant 0 : i32
    %c0_i32_2 = arith.constant 0 : i32
    return %c0_i32, %c0_i32_0, %c0_i32_1 : i32, i32, i32
  }
  func.func @transform_8(%arg0: i32, %arg1: i32) -> (i32, i32) {
    %c0_i32 = arith.constant 0 : i32
    %c0_i32_0 = arith.constant 0 : i32
    %c0_i32_1 = arith.constant 0 : i32
    return %c0_i32, %c0_i32_0 : i32, i32
  }
  func.func @transform_9(%arg0: i32, %arg1: i32) -> (i32, i32, i32) {
    %c0_i32 = arith.constant 0 : i32
    %c0_i32_0 = arith.constant 0 : i32
    return %arg0, %c0_i32, %arg1 : i32, i32, i32
  }
  func.func @transform_10(%arg0: i32, %arg1: i32) -> (i32, i32, i32) {
    %c0_i32 = arith.constant 0 : i32
    %c0_i32_0 = arith.constant 0 : i32
    return %arg0, %c0_i32, %arg1 : i32, i32, i32
  }
  func.func @transform_11(%arg0: i32, %arg1: i32) -> (i32, i32, i32, i32) {
    %c0_i32 = arith.constant 0 : i32
    %c0_i32_0 = arith.constant 0 : i32
    %c0_i32_1 = arith.constant 0 : i32
    return %arg0, %arg1, %c0_i32, %c0_i32_0 : i32, i32, i32, i32
  }
}

</mosaic_0001>

<bundles_post_ra>
// kernel: resnet_ibn_forward.3
= control target key start
LH: loop header
LB: loop body
LE: loop exit
PB: predicated region body
PF: predicated region fallthrough
CT: control target
= control target key end

     0   :  { %9 = vsyncpa [#allocation3], 0  ;;  %s652_s0 = inlined_call_operand.vmem [shape: bf16[2,8,8], index: 0, kind: input, shape index: {}]   ;;  %s653_s1 = inlined_call_operand.vmem [shape: bf16[2,8,8], index: 1, kind: input, shape index: {}]   ;;  %s654_s2 = inlined_call_operand.vmem [shape: f32[8,1], index: 2, kind: input, shape index: {}]   ;;  %s655_s3 = inlined_call_operand.vmem [shape: f32[8,1], index: 3, kind: input, shape index: {}]   ;;  %s656_s4 = inlined_call_operand.hbm [shape: f32[2,8,8], index: 4, kind: output, shape index: {}]  }
   0x1   :  { %11 = vsyncpa [#allocation3 + $0x1], 0  ;;  %s544_s15 = smov 0   ;;  %s546_s16 = smov 0  }
   0x2   :  { %s548_s17 = smov 0   ;;  %s550_s18 = smov 0  }
   0x3   :  { %s552_s19 = smov 0   ;;  %s554_s20 = smov 0  }
   0x4 LB: > { %s370_s21 = sadd.s32 4294967295, %s515_s20   ;;  %s371_s22 = sadd.s32 4294967294, %s515_s20   ;;  %s515_s20 = sphi %s554_s20, %s17_s20   ;;  %s511_s19 = sphi %s552_s19, %s663_s19   ;;  %s507_s18 = sphi %s550_s18, %s662_s18   ;;  %s503_s17 = sphi %s548_s17, %s661_s17   ;;  %s499_s16 = sphi %s546_s16, %s660_s16   ;;  %s495_s15 = sphi %s544_s15, %s659_s15  }
   0x5   : > { %s29_s23 = sadd.s32 1, %s511_s19  ;;  %s136_s24 = sadd.s32 1, %s503_s17 }
   0x6   : > { %p31_p0 = scmp.ge.s32.totalorder %s29_s23, 2  ;;  %p146_p1 = scmp.ne.s32.totalorder %s503_s17, %s499_s16 }
   0x7   : > { %p147_p2 = scmp.eq.s32.totalorder %s370_s21, 1  ;;  %p152_p3 = scmp.ne.s32.totalorder %s499_s16, %s495_s15 }
   0x8   : > { %s665_s23 = smov (%p31_p0, %s29_s23), 0  ;;  %p153_p5 = scmp.eq.s32.totalorder %s371_s22, 1 }
   0x9   : > { %p584_p4 = por %p147_p2, %p146_p1  ;;  %s131_s26 = ssub.s32 %s511_s19, %s665_s23 }
   0xa   : > { %p374_p6 = scmp.ge.s32.totalorder %s515_s20, 1  ;;  %p134_p7 = scmp.eq.s32.totalorder %s131_s26, 0 }
   0xb   : > { %p591_p8 = por %p153_p5, %p152_p3  ;;  %p197_p9 = scmp.lt.s32.totalorder %s515_s20, 3 }
   0xc   : > { %s597_s28 = scalar_select %p134_p7, %s503_s17, %s136_s24  }
   0xd   : > { %p198_p10 = pnand %p374_p6, %p197_p9 }
   0xe   : > { %p232_p11 = scmp.lt.s32.totalorder (!%p198_p10), %s507_s18, 1  ;;  %s229_s12 = sand.u32 (!%p198_p10), 1, %s499_s16  }
   0xf   : > { %201 = sbr.rel (%p198_p10) target bundleno = 170 (0xaa), region = 36  ;;  %s375_s22 = sshll.u32 (!%p198_p10), %s229_s12, 3 }
  0x10   : > { %s379_s24 = sshll.u32 (!%p198_p10), %s507_s18, 7  ;;  %s231_s26 = scalar_lea.vmem (!%p198_p10), [#allocation2], %s375_s22 }
  0x11   : > { %s284_s29 = sshll.u32 (!%p198_p10), %s231_s26, 4  ;;  %s282_s6 = scalar_lea.hbm (!%p198_p10), %s656_s4, %s379_s24  ;;  %s285_s29 = int_to_ptr.vmem [resolvable:$true] %s284_s29 }
  0x12   : > { %s518_s9 = smov (!%p198_p10), [#allocation2]  }
  0x13   : > { %s443_s10 = sshll.u32 (!%p198_p10), %s518_s9, 4  ;;  %s444_s10 = int_to_ptr.vmem [resolvable:$false] %s443_s10 }
  0x14   : > { %v250_v0 = vld [vmem:[%s654_s2] sm:$0xff]  ;;  %v517_v1 = vmov 0   ;;  %s233_s7 = scalar_select %p232_p11, %s507_s18, 1 }
  0x15   : > { %438 = vset.pattern.permute.xlu0 %v517_v1  ;;  %v257_v2 = vld [vmem:[%s655_s3] sm:$0xff]  ;;  %s445_s18 = scalar_lea.vmem %s444_s10, 256  ;;  %p446_p1 = scmp.lt.s32.totalorder %s285_s29, %s444_s10 }
  0x16   : > { %253 = vperm.xlu0 %438, %v250_v0   ;;  %s376_s8 = sshll.u32 %s233_s7, 2  ;;  %s270_s7 = scalar_lea.sflag [#allocation3], %s229_s12 }
  0x17   : > { %s238_s11 = scalar_lea.vmem %s652_s0, %s376_s8  ;;  %s245_s21 = scalar_lea.vmem %s653_s1, %s376_s8 }
  0x18   : > { %v246_v3 = vld [vmem:[%s238_s11] sm:$0xf]  ;;  %s439_s8 = scalar_lea.vmem %s285_s29, 128 }
  0x19   : > { %v247_v4 = vunpack.c.l.bf16 %v246_v3  ;;  %v248_v6 = vld [vmem:[%s245_s21] sm:$0xf]  ;;  %p440_p12 = scmp.ne.s32.totalorder %s285_s29, %s439_s8  ;;  %p447_p2 = scmp.lt.s32.totalorder %s445_s18, %s439_s8 }
  0x1a   : > { %260 = vperm.xlu0 %438, %v257_v2   ;;  %v249_v10 = vunpack.c.l.bf16 %v248_v6 }
  0x1b   : > { %p441_p13 = pnand %p440_p12, %p584_p4  ;;  %p448_p3 = por %p447_p2, %p446_p1 }
  0x1d   : > { %p442_p0 = pneg %p441_p13 }
  0x1f   : > { %p449_p5 = pnand %p448_p3, %p442_p0 }
  0x91   : > { %v254_v5 = vpop.permute.xlu0 %253 }
  0x92   : > { %v256_v7 = vmul.f32 %v254_v5, %v247_v4 }
  0x95   : > { %v261_v8 = vpop.permute.xlu0 %260 }
  0x96   : > { %v263_v9 = vadd.f32 %v261_v8, %v256_v7 }
  0x98   : > { %vm264_vm0 = vcmp.gt.f32.partialorder %v263_v9, 0.0  ;;  %v265_v11 = vmul.f32 0.1, %v263_v9 }
  0x9a   : > { %v266_v12 = vsel %vm264_vm0, %v263_v9, %v265_v11 }
  0x9b   : > { %v267_v13 = vadd.f32 %v266_v12, %v249_v10 }
  0x9d   : > { %268 = vst [vmem:[%s231_s26] sm:$0xff] %v267_v13 }
  0x9e   : > { %452 = shalt.err (!%p449_p5)
}
  0x9f   : > { %s453_s11 = scalar_lea.hbm %s282_s6, 128  ;;  %s457_s14 = scalar_lea.hbm %s656_s4, 256 }
  0xa0   : > { %p454_p6 = scmp.ne.s32.totalorder %s282_s6, %s453_s11  ;;  %p458_p10 = scmp.lt.s32.totalorder %s282_s6, %s656_s4 }
  0xa1   : > { %p459_p11 = scmp.lt.s32.totalorder %s457_s14, %s453_s11 }
  0xa2   : > { %p455_p7 = pnand %p454_p6, %p584_p4 }
  0xa3   : > { %p460_p12 = por %p459_p11, %p458_p10 }
  0xa4   : > { %p456_p9 = pneg %p455_p7 }
  0xa6   : > { %p461_p13 = pnand %p460_p12, %p456_p9 }
  0xa8   : > { %464 = shalt.err (!%p461_p13)
}
  0xa9   : > { %382 = dma.vmem_to_hbm [thread:$0]  (%p584_p4), %s285_s29, 128, %s282_s6, %s270_s7  }
  0xaa PF: > { %p388_p0 = scmp.ge.s32.totalorder %s515_s20, 2  ;;  %s296_s24 = sand.u32 1, %s495_s15  }
  0xab   : > { %s297_s26 = scalar_lea.sflag [#allocation3], %s296_s24 }
  0xac   : > { %p385_p1 = pnand %p388_p0, %p591_p8 }
  0xae   : > { %p386_p2 = pneg %p385_p1 }
  0xb0   : > { %490 = dma.done.wait (%p386_p2), %s297_s26, 128  }
  0xb1   : > { %492 = vsyncadd (%p386_p2), %s297_s26, 4294967168  ;;  %s17_s20 = sadd.s32 1, %s515_s20   ;;  %s659_s15 = smov %s499_s16 }
  0xb2   : > { %p14_p3 = scmp.ge.s32.totalorder %s17_s20, 4   ;;  %s660_s16 = smov %s503_s17 }
  0xb3   : > { %s661_s17 = smov %s597_s28  ;;  %s662_s18 = smov %s511_s19 }
  0xb4   : > { %s663_s19 = smov %s665_s23  ;;  %16 = sbr.rel (!%p14_p3) target bundleno = 4 (0x4), region = 74 }
  0xb9   :  { %302 = vsyncpa [#allocation3], 1 }
  0xba   :  { %304 = vsyncpa [#allocation3 + $0x1], 1 }

// kernel: resnet_ibn_forward.2
= control target key start
LH: loop header
LB: loop body
LE: loop exit
PB: predicated region body
PF: predicated region fallthrough
CT: control target
= control target key end

     0   :  { %s1387_s17 = smov 0   ;;  %s1389_s18 = smov 0   ;;  %s1525_s0 = inlined_call_operand.vmem [shape: bf16[2,4,8], index: 0, kind: input, shape index: {}]   ;;  %s1526_s1 = inlined_call_operand.vmem [shape: bf16[2,4,8], index: 1, kind: input, shape index: {}]   ;;  %s1527_s2 = inlined_call_operand.vmem [shape: bf16[2,4,8], index: 2, kind: input, shape index: {}]   ;;  %s1528_s3 = inlined_call_operand.vmem [shape: bf16[8,4], index: 3, kind: input, shape index: {}]   ;;  %s1529_s4 = inlined_call_operand.vmem [shape: f32[8,1], index: 4, kind: input, shape index: {}]   ;;  %s1530_s5 = inlined_call_operand.vmem [shape: bf16[3,8,8], index: 5, kind: input, shape index: {}]   ;;  %s1531_s6 = inlined_call_operand.vmem [shape: f32[8,1], index: 6, kind: input, shape index: {}]   ;;  %s1532_s7 = inlined_call_operand.vmem [shape: bf16[3,8,4], index: 7, kind: input, shape index: {}]   ;;  %s1533_s8 = inlined_call_operand.vmem [shape: f32[8,1], index: 8, kind: input, shape index: {}]   ;;  %s1534_s9 = inlined_call_operand.vmem [shape: bf16[2,8,8], index: 9, kind: output, shape index: {0}]   ;;  %s1535_s10 = inlined_call_operand.vmem [shape: bf16[2,8,8], index: 10, kind: output, shape index: {1}]   ;;  %s1536_s11 = inlined_call_operand.vmem [shape: f32[2,1,8,2], index: 11, kind: output, shape index: {2}]  }
   0x1   :  { %s1391_s19 = smov 0  }
   0x2 LB: > { %s34_s20 = sadd.s32 1, %s1318_s18  ;;  %p1177_p0 = scmp.ge.s32.totalorder %s1322_s19, 1  ;;  %s1322_s19 = sphi %s1391_s19, %s22_s19   ;;  %s1318_s18 = sphi %s1389_s18, %s1538_s18   ;;  %s1314_s17 = sphi %s1387_s17, %s1537_s17  }
   0x3   : > { %p36_p1 = scmp.ge.s32.totalorder %s34_s20, 2  ;;  %p392_p2 = scmp.lt.s32.totalorder %s1322_s19, 3 }
   0x5   : > { %s1540_s20 = smov (%p36_p1, %s34_s20), 0  ;;  %p393_p3 = pnand %p1177_p0, %p392_p2 }
   0x6   : > { %p464_p4 = scmp.lt.s32.totalorder (!%p393_p3), %s1314_s17, 1 }
   0x7   : > { %396 = sbr.rel (%p393_p3) target bundleno = 581 (0x245), region = 56 }
   0xc   : > { %v1324_v0 = vmov 0.0   ;;  %v516_v1 = vld [vmem:[%s1529_s4] sm:$0xff]  ;;  %s1542_s17 = smov (!%p464_p4, %s1314_s17), 1  ;;  %vm1325_vm0 = vmmov 0   ;;  %v1326_v2 = vmov 0   ;;  %vm526_vm1 = vcmask 1041408  }
   0xd   : > { %1217 = vmatprep.subr.bf16.mxu0 %v1324_v0  ;;  %1223 = vmatprep.subr.bf16.mxu1 %v1324_v0  ;;  %s1178_s23 = sshll.u32 %s1542_s17, 1  ;;  %v818_v5 = vld [vmem:[%s1531_s6] sm:$0xff]  ;;  %vm522_vm2 = vcmask 31744   ;;  %v507_v11 = vlaneseq  ;;  %vm678_vm6 = vcmask 1043456   ;;  %vm674_vm7 = vcmask 64512   ;;  %s1181_s15 = sshll.u32 %s1542_s17, 2 }
   0xe   : > { %1219 = vmatprep.mubr.msk.bf16.mxu0 %vm1325_vm0, %v1324_v0  ;;  %1225 = vmatprep.mubr.msk.bf16.mxu1 %vm1325_vm0, %v1324_v0  ;;  %s470_s26 = scalar_lea.vmem %s1525_s0, %s1178_s23  ;;  %s477_s29 = scalar_lea.vmem %s1526_s1, %s1178_s23  ;;  %v515_v9 = vld [vmem:[%s1528_s3] sm:$0xf]  ;;  %v1187_v35 = vld [vmem:[%s1530_s5 + $0x4] sm:$0xf]  ;;  %v1190_v44 = vld [vmem:[%s1530_s5 + $0x8] sm:$0xf] }
   0xf   : > { %1298 = vset.pattern.permute.xlu0 %v1326_v2  ;;  %1299 = vset.pattern.permute.xlu1 %v1326_v2  ;;  %v512_v3 = vld [vmem:[%s470_s26] sm:$0x3]  ;;  %s484_s13 = scalar_lea.vmem %s1527_s2, %s1178_s23  ;;  %v1453_v12 = vand.u32 127, %v507_v11  ;;  %v1192_v45 = vld [vmem:[%s1532_s7 + $0x4] sm:$0xf]  ;;  %s491_s22 = scalar_lea.vmem %s1534_s9, %s1181_s15  ;;  %vm976_vm10 = vcmask 7168  }
  0x10   : > { %519 = vperm.xlu0 %1298, %v516_v1   ;;  %v513_v4 = vld [vmem:[%s477_s29] sm:$0x3]  ;;  %v1430_v6 = vsel %vm526_vm1, %v512_v3, 0  ;;  %v1195_v47 = vld [vmem:[%s1532_s7 + $0x8] sm:$0xf]  ;;  %s1183_s25 = sshll.u32 %s1542_s17, 3  ;;  %s498_s12 = scalar_lea.vmem %s1535_s10, %s1181_s15 }
  0x11   : > { %v578_v7 = vsel %vm526_vm1, %v513_v4, 0  ;;  %v514_v8 = vld [vmem:[%s484_s13] sm:$0x3]  ;;  %1218 = vmatpush3.bf16.msra.mxu0 %v1430_v6  ;;  %vm573_vm3 = vcmp.eq.s32.totalorder %v1453_v12, 0  ;;  %vm970_vm9 = vcmp.lt.s32.totalorder %v1453_v12, 8  ;;  %s505_s28 = scalar_lea.vmem %s1536_s11, %s1183_s25  ;;  %vm981_vm11 = vcmask 15368  }
  0x12   : > { %1224 = vmatpush3.bf16.msra.mxu1 %v578_v7  ;;  %1229 = vmatprep.subr.bf16.mxu0 %v1324_v0  ;;  %v1439_v10 = vsel %vm526_vm1, %v514_v8, 0  ;;  %v669_v37 = vld [vmem:[%s1530_s5] sm:$0xf] }
  0x13   : > { %1235 = vmatprep.subr.bf16.mxu1 %v1324_v0  ;;  %v825_v46 = vld [vmem:[%s1532_s7] sm:$0xf] }
  0x14   : > { %821 = vperm.xlu0 %1298, %v818_v5   ;;  %1220 = vmatmul.mubr.msk.bf16.vlgmr.msra.gmra.mxu0 %vm522_vm2, %v515_v9 }
  0x15   : > { %1226 = vmatmul.mubr.msk.bf16.vlgmr.msra.gmra.mxu1 %vm522_vm2, %v515_v9  ;;  %1230 = vmatpush3.bf16.msra.mxu0 %v1439_v10 }
  0x16   : > { %1231 = vmatprep.mubr.msk.bf16.mxu0 %vm1325_vm0, %v1324_v0  ;;  %1241 = vmatprep.subr.bf16.mxu0 %v1324_v0 }
  0x17   : > { %1237 = vmatprep.mubr.msk.bf16.mxu1 %vm1325_vm0, %v1324_v0 }
  0x1c   : > { %1232 = vmatmul.mubr.msk.bf16.vlgmr.msra.gmra.mxu0 %vm522_vm2, %v515_v9 }
  0x1d   : > { %1243 = vmatprep.mubr.msk.bf16.mxu0 %vm1325_vm0, %v1324_v0 }
  0x8b   : > { %v520_v13 = vpop.permute.xlu0 %519 }
  0x8f   : > { %v822_v60 = vpop.permute.xlu0 %821 }
  0xd4   : > { %v564_v14 = vpop.f32.mrf.mxu0 }
  0xd5   : > { %v614_v15 = vpop.f32.mrf.mxu1  ;;  %v565_v16 = vadd.f32 %v564_v14, %v520_v13 }
  0xd6   : > { %v615_v17 = vadd.f32 %v614_v15, %v520_v13  ;;  %v1221_v18 = vpop.f32.mrf.mxu0 }
  0xd7   : > { %v1227_v19 = vpop.f32.mrf.mxu1  ;;  %vm570_vm4 = vcmp.gt.f32.partialorder %v565_v16, 0.0  ;;  %v571_v20 = vmul.f32 0.1, %v565_v16 }
  0xd8   : > { %vm620_vm5 = vcmp.gt.f32.partialorder %v615_v17, 0.0  ;;  %v621_v21 = vmul.f32 0.1, %v615_v17  ;;  %v567_v22 = vpop.f32.mrf.mxu0 }
  0xd9   : > { %v617_v23 = vpop.f32.mrf.mxu1  ;;  %v572_v24 = vsel %vm570_vm4, %v565_v16, %v571_v20 }
  0xda   : > { %v622_v25 = vsel %vm620_vm5, %v615_v17, %v621_v21  ;;  %v1222_v27 = vpop.f32.mrf.mxu0  ;;  %v576_v29 = vsel %vm573_vm3, 0.0, %v572_v24  ;;  %v960_v17 = vld [vmem:[%s1533_s8] sm:$0xff] }
  0xdb   : > { %v673_v26 = vpack.c.bf16 %v622_v25, %v622_v25  ;;  %v1228_v28 = vpop.f32.mrf.mxu1  ;;  %v670_v30 = vpack.c.bf16 %v576_v29, %v576_v29 }
  0xdc   : > { %v660_v31 = vpop.f32.mrf.mxu0 }
  0xdd   : > { %v680_v32 = vsel %vm678_vm6, %v673_v26, 0  ;;  %v661_v33 = vadd.f32 %v660_v31, %v520_v13  ;;  %v726_v34 = vsel %vm678_vm6, %v670_v30, 0 }
  0xde   : > { %1236 = vmatpush3.bf16.msra.mxu1 %v680_v32  ;;  %v1233_v36 = vpop.f32.mrf.mxu0  ;;  %1242 = vmatpush3.bf16.msra.mxu0 %v726_v34 }
  0xdf   : > { %1247 = vmatprep.subr.bf16.mxu1 %v1324_v0  ;;  %vm666_vm8 = vcmp.gt.f32.partialorder %v661_v33, 0.0  ;;  %v667_v38 = vmul.f32 0.1, %v661_v33  ;;  %1253 = vmatprep.subr.bf16.mxu0 %v1324_v0 }
  0xe0   : > { %v663_v39 = vpop.f32.mrf.mxu0 }
  0xe1   : > { %1238 = vmatmul.mubr.msk.bf16.vlgmr.msra.gmra.mxu1 %vm674_vm7, %v1187_v35  ;;  %v668_v40 = vsel %vm666_vm8, %v661_v33, %v667_v38  ;;  %1244 = vmatmul.mubr.msk.bf16.vlgmr.msra.gmra.mxu0 %vm674_vm7, %v669_v37 }
  0xe2   : > { %1249 = vmatprep.mubr.msk.bf16.mxu1 %vm1325_vm0, %v1324_v0  ;;  %v770_v41 = vpack.c.bf16 %v668_v40, %v668_v40  ;;  %v1234_v42 = vpop.f32.mrf.mxu0  ;;  %1254 = vmatpush3.bf16.msra.mxu0 %v578_v7 }
  0xe3   : > { %1255 = vmatprep.mubr.msk.bf16.mxu0 %vm1325_vm0, %v1324_v0  ;;  %1265 = vmatprep.subr.bf16.mxu0 %v1324_v0 }
  0xe4   : > { %v775_v43 = vsel %vm678_vm6, %v770_v41, 0 }
  0xe5   : > { %1248 = vmatpush3.bf16.msra.mxu1 %v775_v43 }
  0xe6   : > { %1259 = vmatprep.subr.bf16.mxu1 %v1324_v0 }
  0xe9   : > { %1250 = vmatmul.mubr.msk.bf16.vlgmr.msra.gmra.mxu1 %vm674_vm7, %v1190_v44  ;;  %1256 = vmatmul.mubr.msk.bf16.vlgmr.msra.gmra.mxu0 %vm522_vm2, %v1192_v45 }
  0xea   : > { %1260 = vmatpush3.bf16.msra.mxu1 %v1430_v6  ;;  %1261 = vmatprep.mubr.msk.bf16.mxu1 %vm1325_vm0, %v1324_v0 }
  0xeb   : > { %1266 = vmatpush3.bf16.msra.mxu0 %v1439_v10  ;;  %1267 = vmatprep.mubr.msk.bf16.mxu0 %vm1325_vm0, %v1324_v0 }
  0xf1   : > { %1262 = vmatmul.mubr.msk.bf16.vlgmr.msra.gmra.mxu1 %vm522_vm2, %v825_v46  ;;  %1268 = vmatmul.mubr.msk.bf16.vlgmr.msra.gmra.mxu0 %vm522_vm2, %v1195_v47 }
 0x1a1   : > { %v716_v48 = vpop.f32.mrf.mxu1  ;;  %v762_v49 = vpop.f32.mrf.mxu0 }
 0x1a2   : > { %v763_v55 = vadd.f32 %v762_v49, %v716_v48 }
 0x1a3   : > { %v1239_v50 = vpop.f32.mrf.mxu1  ;;  %v1245_v51 = vpop.f32.mrf.mxu0 }
 0x1a5   : > { %v719_v52 = vpop.f32.mrf.mxu1  ;;  %v765_v53 = vpop.f32.mrf.mxu0 }
 0x1a7   : > { %v1240_v54 = vpop.f32.mrf.mxu1  ;;  %v1246_v56 = vpop.f32.mrf.mxu0 }
 0x1a9   : > { %v811_v57 = vpop.f32.mrf.mxu1  ;;  %v865_v59 = vpop.f32.mrf.mxu0 }
 0x1aa   : > { %v817_v58 = vadd.f32 %v811_v57, %v763_v55 }
 0x1ab   : > { %v1251_v61 = vpop.f32.mrf.mxu1  ;;  %v1257_v63 = vpop.f32.mrf.mxu0 }
 0x1ac   : > { %v824_v62 = vadd.f32 %v822_v60, %v817_v58 }
 0x1ad   : > { %v814_v0 = vpop.f32.mrf.mxu1  ;;  %v868_v3 = vpop.f32.mrf.mxu0 }
 0x1ae   : > { %v973_v1 = vsel %vm970_vm9, %v824_v62, 0.0  ;;  %v983_v2 = vpack.c.bf16 %v824_v62, %v824_v62 }
 0x1af   : > { %v1252_v4 = vpop.f32.mrf.mxu1  ;;  %974 = vadd.xlane.f32.xlu1 %v973_v1  ;;  %v978_v5 = vmul.f32 %v973_v1, %v973_v1  ;;  %v1258_v6 = vpop.f32.mrf.mxu0 }
 0x1b0   : > { %984 = vst [vmem:[%s491_s22] sm:$0xf] %v983_v2 }
 0x1b1   : > { %979 = vadd.xlane.f32.xlu0 %v978_v5  ;;  %v908_v7 = vpop.f32.mrf.mxu1  ;;  %v953_v10 = vpop.f32.mrf.mxu0 }
 0x1b2   : > { %v909_v8 = vadd.f32 %v908_v7, %v865_v59 }
 0x1b3   : > { %v1263_v9 = vpop.f32.mrf.mxu1  ;;  %v1269_v13 = vpop.f32.mrf.mxu0 }
 0x1b4   : > { %v959_v11 = vadd.f32 %v953_v10, %v909_v8 }
 0x1b5   : > { %v911_v12 = vpop.f32.mrf.mxu1  ;;  %v956_v15 = vpop.f32.mrf.mxu0 }
 0x1b7   : > { %v1264_v14 = vpop.f32.mrf.mxu1  ;;  %v1270_v16 = vpop.f32.mrf.mxu0 }
 0x1c0   : > { %963 = vperm.xlu1 %1299, %v960_v17  }
 0x238   : > { %v975_v18 = vpop.xlane.xlu1 %974 }
 0x239   : > { %977 = vst.msk [vmem:[%s505_s28] sm:$0xff] %vm976_vm10, %v975_v18 }
 0x23a   : > { %v980_v19 = vpop.xlane.xlu0 %979 }
 0x23b   : > { %982 = vst.msk [vmem:[%s505_s28] sm:$0xff] %vm981_vm11, %v980_v19 }
 0x23c   : > { %v964_v20 = vpop.permute.xlu1 %963 }
 0x23d   : > { %v966_v21 = vadd.f32 %v964_v20, %v959_v11 }
 0x23f   : > { %vm967_vm12 = vcmp.gt.f32.partialorder %v966_v21, 0.0  ;;  %v968_v22 = vmul.f32 0.1, %v966_v21 }
 0x241   : > { %v969_v23 = vsel %vm967_vm12, %v966_v21, %v968_v22 }
 0x242   : > { %v985_v24 = vpack.c.bf16 %v969_v23, %v969_v23 }
 0x244   : > { %986 = vst [vmem:[%s498_s12] sm:$0xf] %v985_v24 }
 0x245 PF: > { %s22_s19 = sadd.s32 1, %s1322_s19   ;;  %s1537_s17 = smov %s1318_s18 }
 0x246   : > { %p19_p5 = scmp.ge.s32.totalorder %s22_s19, 4   ;;  %s1538_s18 = smov %s1540_s20 }
 0x248   :  { %21 = sbr.rel (!%p19_p5) target bundleno = 2 (0x2), region = 120 }

</bundles_post_ra>
